<compile_context>
chip_gen: v7x
topology: tpu7x:2x2x1
jax: 0.10.0
libtpu: 0.0.40
codegen_flags: <defaults>
</compile_context>

<pallas_src>
import functools
import math

import jax
import jax.numpy as jnp
from jax import lax
from jax.experimental import pallas as pl
from jax.experimental.pallas import tpu as pltpu


def _attention_kernel(x_ref, wq_ref, bq_ref, wk_ref, bk_ref, wv_ref, bv_ref,
                      wo_ref, bo_ref, *rest,
                      num_groups, heads_per_step, head_dim, block_q, kv_len,
                      vis):
    """One grid step = (batch b, head group g, query tile qi).

    Ref shapes (leading grid dims squeezed away), hd = heads_per_step*head_dim:
      x_ref   : (S_pad, H)    full (padded) sequence of batch b
      wq/wk/wv_ref : (H, hd)  group-g slice of the projection weights
      bq/bk/bv_ref : (1, hd)  group-g slice of the projection biases
      wo_ref  : (hd, H)       group-g rows of the output projection
      bo_ref  : (1, H)
      out_ref : (S_pad, H)    attention_output rows of batch b (written at last group)
      probs_ref (only if vis): (hp, block_q, S_pad) attention weights for (b, g, qi)
      k_scr/v_scr : (S_pad, hd)   per-(b, g) K/V cache (filled at qi == 0)
      acc_ref : (S_pad, H) f32    output-projection accumulator (per batch)
    """
    if vis:
        out_ref, probs_ref, k_scr, v_scr, acc_ref = rest
    else:
        out_ref, k_scr, v_scr, acc_ref = rest
        probs_ref = None

    g = pl.program_id(1)
    qi = pl.program_id(2)
    dt = x_ref.dtype
    scale = 1.0 / math.sqrt(head_dim)

    # ---- once per (batch, head group): project K/V into VMEM scratch --------
    @pl.when(qi == 0)
    def _project_kv():
        x = x_ref[...]                                              # (S_pad, H)
        k_scr[...] = (jnp.dot(x, wk_ref[...],
                              preferred_element_type=jnp.float32)
                      + bk_ref[...]).astype(k_scr.dtype)
        v_scr[...] = (jnp.dot(x, wv_ref[...],
                              preferred_element_type=jnp.float32)
                      + bv_ref[...]).astype(v_scr.dtype)

    # ---- once per batch: zero the output-projection accumulator -------------
    @pl.when((g == 0) & (qi == 0))
    def _init_acc():
        acc_ref[...] = jnp.zeros_like(acc_ref)

    row0 = pl.multiple_of(qi * block_q, block_q)
    xq = x_ref[pl.ds(row0, block_q), :]                             # (block_q, H)

    # Packed query projection (MXU width hd); 1/sqrt(d) folded into q once.
    q_all = (jnp.dot(xq, wq_ref[...], preferred_element_type=jnp.float32)
             + bq_ref[...]) * scale
    q_all = q_all.astype(dt)                                        # (block_q, hd)
    k_all = k_scr[...]                                              # (S_pad, hd)
    v_all = v_scr[...]

    s_pad = k_all.shape[0]
    need_mask = kv_len < s_pad
    if need_mask:
        col_ids = lax.broadcasted_iota(jnp.int32, (block_q, s_pad), 1)

    # Per-head attention (contraction dim is head_dim by definition).
    ctx_parts = []
    for i in range(heads_per_step):
        lo = i * head_dim
        hi = lo + head_dim
        q_h = q_all[:, lo:hi]                                       # (block_q, d)
        k_h = k_all[:, lo:hi]                                       # (S_pad, d)
        v_h = v_all[:, lo:hi]

        # scores = q @ k^T (contract head_dim, no explicit transpose).
        scores = lax.dot_general(q_h, k_h, (((1,), (1,)), ((), ())),
                                 preferred_element_type=jnp.float32)
        if need_mask:                                               # padded keys
            scores = jnp.where(col_ids < kv_len, scores, -1e30)

        # Softmax (dim=-1) with f32 statistics.
        scores = scores - jnp.max(scores, axis=-1, keepdims=True)
        e = jnp.exp(scores)
        denom = jnp.sum(e, axis=-1, keepdims=True)
        probs = e * pl.reciprocal(denom, approx=True)               # (block_q, S_pad)

        if vis:
            probs_ref[i] = probs.astype(probs_ref.dtype)

        # attn_dropout is identity in the deterministic forward.
        ctx_parts.append(jnp.dot(probs.astype(dt), v_h,
                                 preferred_element_type=jnp.float32).astype(dt))

    ctx = ctx_parts[0] if heads_per_step == 1 else jnp.concatenate(ctx_parts,
                                                                   axis=-1)
    # Output projection contribution of this head group (accumulated over g).
    contrib = jnp.dot(ctx, wo_ref[...], preferred_element_type=jnp.float32)
    acc_ref[pl.ds(row0, block_q), :] += contrib

    @pl.when(g == num_groups - 1)
    def _finalize():
        out_ref[pl.ds(row0, block_q), :] = (
            acc_ref[pl.ds(row0, block_q), :] + bo_ref[...]).astype(out_ref.dtype)


def _round_up(a, m):
    return ((a + m - 1) // m) * m


def attention_forward(x, params, *, num_heads, vis=True, block_q=256,
                      weights_dtype=jnp.bfloat16, heads_per_step=None,
                      mxu_width=256):
    """x: (B, S, H).  Returns (attention_output, weights-or-None)."""
    B, S, H = x.shape
    assert H % num_heads == 0, "hidden_size must be divisible by num_heads"
    d = H // num_heads

    # ---- head packing: fill the MXU lane width per grid step ----------------
    if heads_per_step is None:
        heads_per_step = max(1, min(num_heads, mxu_width // max(d, 1)))
    heads_per_step = max(1, min(heads_per_step, num_heads))
    while num_heads % heads_per_step != 0:
        heads_per_step -= 1
    hp = heads_per_step
    n_g = num_heads // hp
    hd = hp * d

    # ---- pad S so q-tiles divide evenly and stores stay lane/sublane dense --
    S_pad = _round_up(S, 128) if S >= 128 else _round_up(S, 8)
    block_q = max(8, min(block_q, S_pad))
    if S_pad % block_q != 0:
        block_q = 128 if S_pad % 128 == 0 else 8
    n_q = S_pad // block_q
    if S_pad != S:
        x = jnp.pad(x, ((0, 0), (0, S_pad - S), (0, 0)))

    # ---- pre-split the (in, out)-layout weights per head group --------------
    def split_in(w):    # (H, H) -> (n_g, H, hd)
        return w.reshape(H, n_g, hd).transpose(1, 0, 2)

    def split_bias(b):  # (1, H) -> (n_g, 1, hd)
        return b.reshape(1, n_g, hd).transpose(1, 0, 2)

    wq, wk, wv = split_in(params["wq"]), split_in(params["wk"]), split_in(params["wv"])
    bq, bk, bv = split_bias(params["bq"]), split_bias(params["bk"]), split_bias(params["bv"])
    wo = params["wo"].reshape(n_g, hd, H)                   # (n_g, hd, H)
    bo = params["bo"]                                        # (1, H)

    kernel = functools.partial(_attention_kernel, num_groups=n_g,
                               heads_per_step=hp, head_dim=d, block_q=block_q,
                               kv_len=S, vis=vis)

    sq = pl.Squeezed()
    x_spec = pl.BlockSpec((sq, S_pad, H), lambda b, g, qi: (b, 0, 0))
    w_in_spec = pl.BlockSpec((sq, H, hd), lambda b, g, qi: (g, 0, 0))
    b_in_spec = pl.BlockSpec((sq, 1, hd), lambda b, g, qi: (g, 0, 0))
    wo_spec = pl.BlockSpec((sq, hd, H), lambda b, g, qi: (g, 0, 0))
    bo_spec = pl.BlockSpec((1, H), lambda b, g, qi: (0, 0))
    out_spec = pl.BlockSpec((sq, S_pad, H), lambda b, g, qi: (b, 0, 0))

    if vis:
        out_shape = (jax.ShapeDtypeStruct((B, S_pad, H), x.dtype),
                     jax.ShapeDtypeStruct((B, num_heads, S_pad, S_pad),
                                          weights_dtype))
        out_specs = [out_spec,
                     pl.BlockSpec((sq, hp, block_q, S_pad),
                                  lambda b, g, qi: (b, g, qi, 0))]
    else:
        out_shape = jax.ShapeDtypeStruct((B, S_pad, H), x.dtype)
        out_specs = out_spec

    scratch_shapes = [pltpu.VMEM((S_pad, hd), x.dtype),      # K cache
                      pltpu.VMEM((S_pad, hd), x.dtype),      # V cache
                      pltpu.VMEM((S_pad, H), jnp.float32)]   # out-proj accumulator

    # ---- VMEM limit from the actual per-step footprint ----------------------
    isz = jnp.dtype(x.dtype).itemsize
    wsz = jnp.dtype(weights_dtype).itemsize
    footprint = (2 * S_pad * H * isz                          # x block (double buffered)
                 + 2 * S_pad * H * isz                        # out block
                 + 2 * (4 * H * hd + 3 * hd + H) * isz        # weight/bias slices
                 + (2 * block_q * S_pad * wsz if vis else 0)  # probs out block
                 + S_pad * H * 4                              # acc scratch
                 + 2 * S_pad * hd * isz                       # K/V scratch
                 + 4 * block_q * S_pad * 4                    # softmax temporaries
                 + 2 * block_q * hd * 4)
    vmem_limit = int(min(128 * 1024 * 1024,
                         max(32 * 1024 * 1024, (footprint * 3) // 2)))

    result = pl.pallas_call(
        kernel,
        out_shape=out_shape,
        grid_spec=pltpu.PrefetchScalarGridSpec(
            num_scalar_prefetch=0,
            grid=(B, n_g, n_q),
            in_specs=[x_spec,
                      w_in_spec, b_in_spec,     # query
                      w_in_spec, b_in_spec,     # key
                      w_in_spec, b_in_spec,     # value
                      wo_spec, bo_spec],        # out projection
            out_specs=out_specs,
            scratch_shapes=scratch_shapes),
        compiler_params=pltpu.CompilerParams(
            dimension_semantics=("parallel", "arbitrary", "arbitrary"),
            vmem_limit_bytes=vmem_limit),
    )(x, wq, bq, wk, bk, wv, bv, wo, bo)

    if vis:
        out, probs = result
        if S_pad != S:
            out = out[:, :S, :]
            probs = probs[:, :, :S, :S]
        return out, probs
    out = result
    if S_pad != S:
        out = out[:, :S, :]
    return out, None


def _reference(x, params, *, num_heads):
    """Plain-JAX reference mirroring the PyTorch forward (posi_emb=None)."""
    B, S, H = x.shape
    d = H // num_heads
    hprec = jax.lax.Precision.HIGHEST

    def lin(t, w, b):
        return jnp.einsum("bsh,ho->bso", t, w, precision=hprec) + b[0]

    q = lin(x, params["wq"], params["bq"])
    k = lin(x, params["wk"], params["bk"])
    v = lin(x, params["wv"], params["bv"])

    def split(t):  # (B, S, H) -> (B, nh, S, d)
        return t.reshape(B, S, num_heads, d).transpose(0, 2, 1, 3)

    q, k, v = split(q), split(k), split(v)
    scores = jnp.einsum("bhqd,bhkd->bhqk", q, k, precision=hprec) / math.sqrt(d)
    probs = jax.nn.softmax(scores, axis=-1)
    ctx = jnp.einsum("bhqk,bhkd->bhqd", probs, v, precision=hprec)
    ctx = ctx.transpose(0, 2, 1, 3).reshape(B, S, H)
    out = lin(ctx, params["wo"], params["bo"])
    return out, probs


def init_params(key, hidden_size):
    ks = jax.random.split(key, 8)

    def w(k):
        return (jax.random.normal(k, (hidden_size, hidden_size), jnp.float32)
                * (1.0 / math.sqrt(hidden_size)))

    def b(k):
        return jax.random.normal(k, (1, hidden_size), jnp.float32) * 0.02

    return {
        "wq": w(ks[0]), "bq": b(ks[1]),
        "wk": w(ks[2]), "bk": b(ks[3]),
        "wv": w(ks[4]), "bv": b(ks[5]),
        "wo": w(ks[6]), "bo": b(ks[7]),
    }


if __name__ == "__main__":
    # ---- small shapes implied by the module (batch=2, seq=8, hidden=32) ----
    B, S, H = 2, 8, 32
    NUM_HEADS = 4               # config.transformer['num_heads']

    key = jax.random.PRNGKey(0)
    kx, kp = jax.random.split(key)
    x = jax.random.normal(kx, (B, S, H), jnp.float32)
    params = init_params(kp, H)

    ref_out, ref_w = _reference(x, params, num_heads=NUM_HEADS)

    # vis=True path: also returns the attention weights (module's `vis` flag).
    out, weights = attention_forward(x, params, num_heads=NUM_HEADS, vis=True)
    jax.block_until_ready((out, weights))
    assert out.shape == (B, S, H)
    assert weights.shape == (B, NUM_HEADS, S, S)
    assert jnp.allclose(out, ref_out, atol=5e-3, rtol=5e-3), "output mismatch"
    assert jnp.allclose(weights.astype(jnp.float32), ref_w,
                        atol=1e-2, rtol=1e-2), "weights mismatch"

    # vis=False path: skips the O(nh*S^2) probability writeback entirely.
    out_nv, w_nv = attention_forward(x, params, num_heads=NUM_HEADS, vis=False)
    jax.block_until_ready(out_nv)
    assert w_nv is None
    assert jnp.allclose(out_nv, ref_out, atol=5e-3, rtol=5e-3), "vis=False mismatch"

    # ---- lane-aligned shapes (multiples of (8,128)) exercising q-tiling ----
    B2, S2, H2, NH2 = 2, 256, 128, 4
    k1, k2 = jax.random.split(jax.random.PRNGKey(1))
    x2 = jax.random.normal(k1, (B2, S2, H2), jnp.float32)
    p2 = init_params(k2, H2)
    out2, w2 = attention_forward(x2, p2, num_heads=NH2, vis=True, block_q=128,
                                 weights_dtype=jnp.float32)
    jax.block_until_ready((out2, w2))
    ref_out2, ref_w2 = _reference(x2, p2, num_heads=NH2)
    assert jnp.allclose(out2, ref_out2, atol=5e-3, rtol=5e-3), "tiled output mismatch"
    assert jnp.allclose(w2, ref_w2, atol=5e-3, rtol=5e-3), "tiled weights mismatch"

    # ---- non-divisible sequence: exercises padding + padded-key masking ----
    B3, S3, H3, NH3 = 1, 200, 128, 8
    k3, k4 = jax.random.split(jax.random.PRNGKey(2))
    x3 = jax.random.normal(k3, (B3, S3, H3), jnp.float32)
    p3 = init_params(k4, H3)
    out3, w3 = attention_forward(x3, p3, num_heads=NH3, vis=True, block_q=128,
                                 weights_dtype=jnp.float32)
    jax.block_until_ready((out3, w3))
    ref_out3, ref_w3 = _reference(x3, p3, num_heads=NH3)
    assert out3.shape == (B3, S3, H3)
    assert w3.shape == (B3, NH3, S3, S3)
    assert jnp.allclose(out3, ref_out3, atol=5e-3, rtol=5e-3), "padded output mismatch"
    assert jnp.allclose(w3, ref_w3, atol=5e-3, rtol=5e-3), "padded weights mismatch"

    print("KERNEL_OK")
</pallas_src>

<mosaic_0001>
module attributes {stable_mosaic.version = 11 : i64} {
  func.func @_attention_kernel(%arg0: i32, %arg1: i32, %arg2: i32, %arg3: memref<1x8x32xf32, #tpu.memory_space<vmem>>, %arg4: memref<1x32x32xf32, #tpu.memory_space<vmem>>, %arg5: memref<1x1x32xf32, #tpu.memory_space<vmem>>, %arg6: memref<1x32x32xf32, #tpu.memory_space<vmem>>, %arg7: memref<1x1x32xf32, #tpu.memory_space<vmem>>, %arg8: memref<1x32x32xf32, #tpu.memory_space<vmem>>, %arg9: memref<1x1x32xf32, #tpu.memory_space<vmem>>, %arg10: memref<1x32x32xf32, #tpu.memory_space<vmem>>, %arg11: memref<1x32xf32, #tpu.memory_space<vmem>>, %arg12: memref<1x8x32xf32, #tpu.memory_space<vmem>>, %arg13: memref<1x4x8x8xbf16, #tpu.memory_space<vmem>>, %arg14: memref<8x32xf32, #tpu.memory_space<vmem>>, %arg15: memref<8x32xf32, #tpu.memory_space<vmem>>, %arg16: memref<8x32xf32, #tpu.memory_space<vmem>>) attributes {dimension_semantics = [#tpu.dimension_semantics<parallel>, #tpu.dimension_semantics<arbitrary>, #tpu.dimension_semantics<arbitrary>], iteration_bounds = array<i64: 2, 1, 1>, scalar_prefetch = 0 : i64, scratch_operands = 3 : i64, tpu.core_type = #tpu.core_type<tc>, window_params = [{transform_indices = @transform_0, window_bounds = array<i64: 1, 8, 32>}, {transform_indices = @transform_1, window_bounds = array<i64: 1, 32, 32>}, {transform_indices = @transform_2, window_bounds = array<i64: 1, 1, 32>}, {transform_indices = @transform_3, window_bounds = array<i64: 1, 32, 32>}, {transform_indices = @transform_4, window_bounds = array<i64: 1, 1, 32>}, {transform_indices = @transform_5, window_bounds = array<i64: 1, 32, 32>}, {transform_indices = @transform_6, window_bounds = array<i64: 1, 1, 32>}, {transform_indices = @transform_7, window_bounds = array<i64: 1, 32, 32>}, {pipeline_mode = #tpu.pipeline_mode<synchronous>, transform_indices = @transform_8, window_bounds = array<i64: 1, 32>}, {transform_indices = @transform_9, window_bounds = array<i64: 1, 8, 32>}, {transform_indices = @transform_10, window_bounds = array<i64: 1, 4, 8, 8>}]} {
    %c0_i32 = arith.constant 0 : i32
    %0 = arith.cmpi eq, %arg2, %c0_i32 : i32
    %1 = arith.extui %0 : i1 to i32
    %c0_i32_0 = arith.constant 0 : i32
    %2 = arith.cmpi ne, %1, %c0_i32_0 : i32
    scf.if %2 {
      %c0_53 = arith.constant 0 : index
      %c0_54 = arith.constant 0 : index
      %c0_55 = arith.constant 0 : index
      %112 = vector.load %arg3[%c0_53, %c0_54, %c0_55] : memref<1x8x32xf32, #tpu.memory_space<vmem>>, vector<1x8x32xf32>
      %113 = vector.shape_cast %112 : vector<1x8x32xf32> to vector<8x32xf32>
      %c0_56 = arith.constant 0 : index
      %c0_57 = arith.constant 0 : index
      %c0_58 = arith.constant 0 : index
      %114 = vector.load %arg6[%c0_56, %c0_57, %c0_58] : memref<1x32x32xf32, #tpu.memory_space<vmem>>, vector<1x32x32xf32>
      %115 = vector.shape_cast %114 : vector<1x32x32xf32> to vector<32x32xf32>
      %cst_59 = arith.constant dense<0.000000e+00> : vector<8x32xf32>
      %116 = tpu.matmul %113, %115, %cst_59 {dimension_numbers = #tpu.dot_dimension_numbers<[1], [0], [0], [1], [0, 0, 1, 1], [], []>} : vector<8x32xf32>, vector<32x32xf32>, vector<8x32xf32> -> vector<8x32xf32>
      %c0_60 = arith.constant 0 : index
      %c0_61 = arith.constant 0 : index
      %c0_62 = arith.constant 0 : index
      %117 = vector.load %arg7[%c0_60, %c0_61, %c0_62] : memref<1x1x32xf32, #tpu.memory_space<vmem>>, vector<1x1x32xf32>
      %118 = vector.shape_cast %117 : vector<1x1x32xf32> to vector<1x32xf32>
      %119 = vector.broadcast %118 : vector<1x32xf32> to vector<8x32xf32>
      %120 = arith.addf %116, %119 : vector<8x32xf32>
      %c0_63 = arith.constant 0 : index
      %c0_64 = arith.constant 0 : index
      %121 = vector.load %arg14[%c0_63, %c0_64] : memref<8x32xf32, #tpu.memory_space<vmem>>, vector<8x32xf32>
      tpu.vector_store %arg14[%c0_63, %c0_64], %120 {strides = array<i32>} : memref<8x32xf32, #tpu.memory_space<vmem>>, vector<8x32xf32>,
      %c0_65 = arith.constant 0 : index
      %c0_66 = arith.constant 0 : index
      %c0_67 = arith.constant 0 : index
      %122 = vector.load %arg8[%c0_65, %c0_66, %c0_67] : memref<1x32x32xf32, #tpu.memory_space<vmem>>, vector<1x32x32xf32>
      %123 = vector.shape_cast %122 : vector<1x32x32xf32> to vector<32x32xf32>
      %cst_68 = arith.constant dense<0.000000e+00> : vector<8x32xf32>
      %124 = tpu.matmul %113, %123, %cst_68 {dimension_numbers = #tpu.dot_dimension_numbers<[1], [0], [0], [1], [0, 0, 1, 1], [], []>} : vector<8x32xf32>, vector<32x32xf32>, vector<8x32xf32> -> vector<8x32xf32>
      %c0_69 = arith.constant 0 : index
      %c0_70 = arith.constant 0 : index
      %c0_71 = arith.constant 0 : index
      %125 = vector.load %arg9[%c0_69, %c0_70, %c0_71] : memref<1x1x32xf32, #tpu.memory_space<vmem>>, vector<1x1x32xf32>
      %126 = vector.shape_cast %125 : vector<1x1x32xf32> to vector<1x32xf32>
      %127 = vector.broadcast %126 : vector<1x32xf32> to vector<8x32xf32>
      %128 = arith.addf %124, %127 : vector<8x32xf32>
      %c0_72 = arith.constant 0 : index
      %c0_73 = arith.constant 0 : index
      %129 = vector.load %arg15[%c0_72, %c0_73] : memref<8x32xf32, #tpu.memory_space<vmem>>, vector<8x32xf32>
      tpu.vector_store %arg15[%c0_72, %c0_73], %128 {strides = array<i32>} : memref<8x32xf32, #tpu.memory_space<vmem>>, vector<8x32xf32>,
    } else {
    }
    %c0_i32_1 = arith.constant 0 : i32
    %3 = arith.cmpi eq, %arg1, %c0_i32_1 : i32
    %c0_i32_2 = arith.constant 0 : i32
    %4 = arith.cmpi eq, %arg2, %c0_i32_2 : i32
    %5 = arith.andi %3, %4 : i1
    %6 = arith.extui %5 : i1 to i32
    %c0_i32_3 = arith.constant 0 : i32
    %7 = arith.cmpi ne, %6, %c0_i32_3 : i32
    scf.if %7 {
      %cst_53 = arith.constant 0.000000e+00 : f32
      %112 = vector.broadcast %cst_53 : f32 to vector<8x32xf32>
      %c0_54 = arith.constant 0 : index
      %c0_55 = arith.constant 0 : index
      %113 = vector.load %arg16[%c0_54, %c0_55] : memref<8x32xf32, #tpu.memory_space<vmem>>, vector<8x32xf32>
      tpu.vector_store %arg16[%c0_54, %c0_55], %112 {strides = array<i32>} : memref<8x32xf32, #tpu.memory_space<vmem>>, vector<8x32xf32>,
    } else {
    }
    %c8_i32 = arith.constant 8 : i32
    %8 = arith.muli %arg2, %c8_i32 : i32
    %9 = tpu.assume_multiple %8, 8 : i32
    %c0 = arith.constant 0 : index
    %10 = arith.index_cast %9 : i32 to index
    %c0_4 = arith.constant 0 : index
    %11 = vector.load %arg3[%c0, %10, %c0_4] : memref<1x8x32xf32, #tpu.memory_space<vmem>>, vector<1x8x32xf32>
    %12 = vector.shape_cast %11 : vector<1x8x32xf32> to vector<8x32xf32>
    %c0_5 = arith.constant 0 : index
    %c0_6 = arith.constant 0 : index
    %c0_7 = arith.constant 0 : index
    %13 = vector.load %arg4[%c0_5, %c0_6, %c0_7] : memref<1x32x32xf32, #tpu.memory_space<vmem>>, vector<1x32x32xf32>
    %14 = vector.shape_cast %13 : vector<1x32x32xf32> to vector<32x32xf32>
    %cst = arith.constant dense<0.000000e+00> : vector<8x32xf32>
    %15 = tpu.matmul %12, %14, %cst {dimension_numbers = #tpu.dot_dimension_numbers<[1], [0], [0], [1], [0, 0, 1, 1], [], []>} : vector<8x32xf32>, vector<32x32xf32>, vector<8x32xf32> -> vector<8x32xf32>
    %c0_8 = arith.constant 0 : index
    %c0_9 = arith.constant 0 : index
    %c0_10 = arith.constant 0 : index
    %16 = vector.load %arg5[%c0_8, %c0_9, %c0_10] : memref<1x1x32xf32, #tpu.memory_space<vmem>>, vector<1x1x32xf32>
    %17 = vector.shape_cast %16 : vector<1x1x32xf32> to vector<1x32xf32>
    %18 = vector.broadcast %17 : vector<1x32xf32> to vector<8x32xf32>
    %19 = arith.addf %15, %18 : vector<8x32xf32>
    %cst_11 = arith.constant 0.353553385 : f32
    %20 = vector.broadcast %cst_11 : f32 to vector<8x32xf32>
    %21 = arith.mulf %19, %20 : vector<8x32xf32>
    %c0_12 = arith.constant 0 : index
    %c0_13 = arith.constant 0 : index
    %22 = vector.load %arg14[%c0_12, %c0_13] : memref<8x32xf32, #tpu.memory_space<vmem>>, vector<8x32xf32>
    %c0_14 = arith.constant 0 : index
    %c0_15 = arith.constant 0 : index
    %23 = vector.load %arg15[%c0_14, %c0_15] : memref<8x32xf32, #tpu.memory_space<vmem>>, vector<8x32xf32>
    %24 = vector.extract_strided_slice %21 {offsets = [0, 0], sizes = [8, 8], strides = [1, 1]} : vector<8x32xf32> to vector<8x8xf32>
    %25 = vector.extract_strided_slice %22 {offsets = [0, 0], sizes = [8, 8], strides = [1, 1]} : vector<8x32xf32> to vector<8x8xf32>
    %26 = vector.extract_strided_slice %23 {offsets = [0, 0], sizes = [8, 8], strides = [1, 1]} : vector<8x32xf32> to vector<8x8xf32>
    %cst_16 = arith.constant dense<0.000000e+00> : vector<8x8xf32>
    %27 = tpu.matmul %24, %25, %cst_16 {dimension_numbers = #tpu.dot_dimension_numbers<[1], [1], [0], [0], [0, 0, 1, 0], [], []>} : vector<8x8xf32>, vector<8x8xf32>, vector<8x8xf32> -> vector<8x8xf32>
    %cst_17 = arith.constant dense<0xFF800000> : vector<8xf32>
    %28 = vector.multi_reduction <maximumf>, %27, %cst_17 [1] : vector<8x8xf32> to vector<8xf32>
    %29 = vector.shape_cast %28 : vector<8xf32> to vector<8x1xf32>
    %30 = vector.broadcast %29 : vector<8x1xf32> to vector<8x8xf32>
    %31 = arith.subf %27, %30 : vector<8x8xf32>
    %32 = math.exp %31 : vector<8x8xf32>
    %cst_18 = arith.constant dense<0.000000e+00> : vector<8xf32>
    %33 = vector.multi_reduction <add>, %32, %cst_18 [1] : vector<8x8xf32> to vector<8xf32>
    %34 = vector.shape_cast %33 : vector<8xf32> to vector<8x1xf32>
    %35 = tpu.reciprocal %34 {approx = true} : vector<8x1xf32> -> vector<8x1xf32>
    %36 = vector.broadcast %35 : vector<8x1xf32> to vector<8x8xf32>
    %37 = arith.mulf %32, %36 : vector<8x8xf32>
    %38 = arith.truncf %37 : vector<8x8xf32> to vector<8x8xbf16>
    %c0_19 = arith.constant 0 : index
    %c0_20 = arith.constant 0 : index
    %c0_21 = arith.constant 0 : index
    %c0_22 = arith.constant 0 : index
    %39 = vector.load %arg13[%c0_19, %c0_20, %c0_21, %c0_22] : memref<1x4x8x8xbf16, #tpu.memory_space<vmem>>, vector<1x1x8x8xbf16>
    %40 = vector.shape_cast %39 : vector<1x1x8x8xbf16> to vector<8x8xbf16>
    %41 = vector.shape_cast %38 : vector<8x8xbf16> to vector<1x1x8x8xbf16>
    tpu.vector_store %arg13[%c0_19, %c0_20, %c0_21, %c0_22], %41 {strides = array<i32>} : memref<1x4x8x8xbf16, #tpu.memory_space<vmem>>, vector<1x1x8x8xbf16>,
    %cst_23 = arith.constant dense<0.000000e+00> : vector<8x8xf32>
    %42 = tpu.matmul %37, %26, %cst_23 {dimension_numbers = #tpu.dot_dimension_numbers<[1], [0], [0], [1], [0, 0, 1, 1], [], []>} : vector<8x8xf32>, vector<8x8xf32>, vector<8x8xf32> -> vector<8x8xf32>
    %43 = vector.extract_strided_slice %21 {offsets = [0, 8], sizes = [8, 8], strides = [1, 1]} : vector<8x32xf32> to vector<8x8xf32>
    %44 = vector.extract_strided_slice %22 {offsets = [0, 8], sizes = [8, 8], strides = [1, 1]} : vector<8x32xf32> to vector<8x8xf32>
    %45 = vector.extract_strided_slice %23 {offsets = [0, 8], sizes = [8, 8], strides = [1, 1]} : vector<8x32xf32> to vector<8x8xf32>
    %cst_24 = arith.constant dense<0.000000e+00> : vector<8x8xf32>
    %46 = tpu.matmul %43, %44, %cst_24 {dimension_numbers = #tpu.dot_dimension_numbers<[1], [1], [0], [0], [0, 0, 1, 0], [], []>} : vector<8x8xf32>, vector<8x8xf32>, vector<8x8xf32> -> vector<8x8xf32>
    %cst_25 = arith.constant dense<0xFF800000> : vector<8xf32>
    %47 = vector.multi_reduction <maximumf>, %46, %cst_25 [1] : vector<8x8xf32> to vector<8xf32>
    %48 = vector.shape_cast %47 : vector<8xf32> to vector<8x1xf32>
    %49 = vector.broadcast %48 : vector<8x1xf32> to vector<8x8xf32>
    %50 = arith.subf %46, %49 : vector<8x8xf32>
    %51 = math.exp %50 : vector<8x8xf32>
    %cst_26 = arith.constant dense<0.000000e+00> : vector<8xf32>
    %52 = vector.multi_reduction <add>, %51, %cst_26 [1] : vector<8x8xf32> to vector<8xf32>
    %53 = vector.shape_cast %52 : vector<8xf32> to vector<8x1xf32>
    %54 = tpu.reciprocal %53 {approx = true} : vector<8x1xf32> -> vector<8x1xf32>
    %55 = vector.broadcast %54 : vector<8x1xf32> to vector<8x8xf32>
    %56 = arith.mulf %51, %55 : vector<8x8xf32>
    %57 = arith.truncf %56 : vector<8x8xf32> to vector<8x8xbf16>
    %c0_27 = arith.constant 0 : index
    %c1 = arith.constant 1 : index
    %c0_28 = arith.constant 0 : index
    %c0_29 = arith.constant 0 : index
    %58 = vector.load %arg13[%c0_27, %c1, %c0_28, %c0_29] : memref<1x4x8x8xbf16, #tpu.memory_space<vmem>>, vector<1x1x8x8xbf16>
    %59 = vector.shape_cast %58 : vector<1x1x8x8xbf16> to vector<8x8xbf16>
    %60 = vector.shape_cast %57 : vector<8x8xbf16> to vector<1x1x8x8xbf16>
    tpu.vector_store %arg13[%c0_27, %c1, %c0_28, %c0_29], %60 {strides = array<i32>} : memref<1x4x8x8xbf16, #tpu.memory_space<vmem>>, vector<1x1x8x8xbf16>,
    %cst_30 = arith.constant dense<0.000000e+00> : vector<8x8xf32>
    %61 = tpu.matmul %56, %45, %cst_30 {dimension_numbers = #tpu.dot_dimension_numbers<[1], [0], [0], [1], [0, 0, 1, 1], [], []>} : vector<8x8xf32>, vector<8x8xf32>, vector<8x8xf32> -> vector<8x8xf32>
    %62 = vector.extract_strided_slice %21 {offsets = [0, 16], sizes = [8, 8], strides = [1, 1]} : vector<8x32xf32> to vector<8x8xf32>
    %63 = vector.extract_strided_slice %22 {offsets = [0, 16], sizes = [8, 8], strides = [1, 1]} : vector<8x32xf32> to vector<8x8xf32>
    %64 = vector.extract_strided_slice %23 {offsets = [0, 16], sizes = [8, 8], strides = [1, 1]} : vector<8x32xf32> to vector<8x8xf32>
    %cst_31 = arith.constant dense<0.000000e+00> : vector<8x8xf32>
    %65 = tpu.matmul %62, %63, %cst_31 {dimension_numbers = #tpu.dot_dimension_numbers<[1], [1], [0], [0], [0, 0, 1, 0], [], []>} : vector<8x8xf32>, vector<8x8xf32>, vector<8x8xf32> -> vector<8x8xf32>
    %cst_32 = arith.constant dense<0xFF800000> : vector<8xf32>
    %66 = vector.multi_reduction <maximumf>, %65, %cst_32 [1] : vector<8x8xf32> to vector<8xf32>
    %67 = vector.shape_cast %66 : vector<8xf32> to vector<8x1xf32>
    %68 = vector.broadcast %67 : vector<8x1xf32> to vector<8x8xf32>
    %69 = arith.subf %65, %68 : vector<8x8xf32>
    %70 = math.exp %69 : vector<8x8xf32>
    %cst_33 = arith.constant dense<0.000000e+00> : vector<8xf32>
    %71 = vector.multi_reduction <add>, %70, %cst_33 [1] : vector<8x8xf32> to vector<8xf32>
    %72 = vector.shape_cast %71 : vector<8xf32> to vector<8x1xf32>
    %73 = tpu.reciprocal %72 {approx = true} : vector<8x1xf32> -> vector<8x1xf32>
    %74 = vector.broadcast %73 : vector<8x1xf32> to vector<8x8xf32>
    %75 = arith.mulf %70, %74 : vector<8x8xf32>
    %76 = arith.truncf %75 : vector<8x8xf32> to vector<8x8xbf16>
    %c0_34 = arith.constant 0 : index
    %c2 = arith.constant 2 : index
    %c0_35 = arith.constant 0 : index
    %c0_36 = arith.constant 0 : index
    %77 = vector.load %arg13[%c0_34, %c2, %c0_35, %c0_36] : memref<1x4x8x8xbf16, #tpu.memory_space<vmem>>, vector<1x1x8x8xbf16>
    %78 = vector.shape_cast %77 : vector<1x1x8x8xbf16> to vector<8x8xbf16>
    %79 = vector.shape_cast %76 : vector<8x8xbf16> to vector<1x1x8x8xbf16>
    tpu.vector_store %arg13[%c0_34, %c2, %c0_35, %c0_36], %79 {strides = array<i32>} : memref<1x4x8x8xbf16, #tpu.memory_space<vmem>>, vector<1x1x8x8xbf16>,
    %cst_37 = arith.constant dense<0.000000e+00> : vector<8x8xf32>
    %80 = tpu.matmul %75, %64, %cst_37 {dimension_numbers = #tpu.dot_dimension_numbers<[1], [0], [0], [1], [0, 0, 1, 1], [], []>} : vector<8x8xf32>, vector<8x8xf32>, vector<8x8xf32> -> vector<8x8xf32>
    %81 = vector.extract_strided_slice %21 {offsets = [0, 24], sizes = [8, 8], strides = [1, 1]} : vector<8x32xf32> to vector<8x8xf32>
    %82 = vector.extract_strided_slice %22 {offsets = [0, 24], sizes = [8, 8], strides = [1, 1]} : vector<8x32xf32> to vector<8x8xf32>
    %83 = vector.extract_strided_slice %23 {offsets = [0, 24], sizes = [8, 8], strides = [1, 1]} : vector<8x32xf32> to vector<8x8xf32>
    %cst_38 = arith.constant dense<0.000000e+00> : vector<8x8xf32>
    %84 = tpu.matmul %81, %82, %cst_38 {dimension_numbers = #tpu.dot_dimension_numbers<[1], [1], [0], [0], [0, 0, 1, 0], [], []>} : vector<8x8xf32>, vector<8x8xf32>, vector<8x8xf32> -> vector<8x8xf32>
    %cst_39 = arith.constant dense<0xFF800000> : vector<8xf32>
    %85 = vector.multi_reduction <maximumf>, %84, %cst_39 [1] : vector<8x8xf32> to vector<8xf32>
    %86 = vector.shape_cast %85 : vector<8xf32> to vector<8x1xf32>
    %87 = vector.broadcast %86 : vector<8x1xf32> to vector<8x8xf32>
    %88 = arith.subf %84, %87 : vector<8x8xf32>
    %89 = math.exp %88 : vector<8x8xf32>
    %cst_40 = arith.constant dense<0.000000e+00> : vector<8xf32>
    %90 = vector.multi_reduction <add>, %89, %cst_40 [1] : vector<8x8xf32> to vector<8xf32>
    %91 = vector.shape_cast %90 : vector<8xf32> to vector<8x1xf32>
    %92 = tpu.reciprocal %91 {approx = true} : vector<8x1xf32> -> vector<8x1xf32>
    %93 = vector.broadcast %92 : vector<8x1xf32> to vector<8x8xf32>
    %94 = arith.mulf %89, %93 : vector<8x8xf32>
    %95 = arith.truncf %94 : vector<8x8xf32> to vector<8x8xbf16>
    %c0_41 = arith.constant 0 : index
    %c3 = arith.constant 3 : index
    %c0_42 = arith.constant 0 : index
    %c0_43 = arith.constant 0 : index
    %96 = vector.load %arg13[%c0_41, %c3, %c0_42, %c0_43] : memref<1x4x8x8xbf16, #tpu.memory_space<vmem>>, vector<1x1x8x8xbf16>
    %97 = vector.shape_cast %96 : vector<1x1x8x8xbf16> to vector<8x8xbf16>
    %98 = vector.shape_cast %95 : vector<8x8xbf16> to vector<1x1x8x8xbf16>
    tpu.vector_store %arg13[%c0_41, %c3, %c0_42, %c0_43], %98 {strides = array<i32>} : memref<1x4x8x8xbf16, #tpu.memory_space<vmem>>, vector<1x1x8x8xbf16>,
    %cst_44 = arith.constant dense<0.000000e+00> : vector<8x8xf32>
    %99 = tpu.matmul %94, %83, %cst_44 {dimension_numbers = #tpu.dot_dimension_numbers<[1], [0], [0], [1], [0, 0, 1, 1], [], []>} : vector<8x8xf32>, vector<8x8xf32>, vector<8x8xf32> -> vector<8x8xf32>
    %100 = tpu.concatenate %42, %61, %80, %99 in 1 : vector<8x8xf32>, vector<8x8xf32>, vector<8x8xf32>, vector<8x8xf32> -> vector<8x32xf32>
    %c0_45 = arith.constant 0 : index
    %c0_46 = arith.constant 0 : index
    %c0_47 = arith.constant 0 : index
    %101 = vector.load %arg10[%c0_45, %c0_46, %c0_47] : memref<1x32x32xf32, #tpu.memory_space<vmem>>, vector<1x32x32xf32>
    %102 = vector.shape_cast %101 : vector<1x32x32xf32> to vector<32x32xf32>
    %cst_48 = arith.constant dense<0.000000e+00> : vector<8x32xf32>
    %103 = tpu.matmul %100, %102, %cst_48 {dimension_numbers = #tpu.dot_dimension_numbers<[1], [0], [0], [1], [0, 0, 1, 1], [], []>} : vector<8x32xf32>, vector<32x32xf32>, vector<8x32xf32> -> vector<8x32xf32>
    %104 = arith.index_cast %9 : i32 to index
    %c0_49 = arith.constant 0 : index
    %105 = vector.load %arg16[%104, %c0_49] : memref<8x32xf32, #tpu.memory_space<vmem>>, vector<8x32xf32>
    %106 = arith.addf %105, %103 : vector<8x32xf32>
    %107 = arith.index_cast %9 : i32 to index
    %c0_50 = arith.constant 0 : index
    %108 = vector.load %arg16[%107, %c0_50] : memref<8x32xf32, #tpu.memory_space<vmem>>, vector<8x32xf32>
    tpu.vector_store %arg16[%107, %c0_50], %106 {strides = array<i32>} : memref<8x32xf32, #tpu.memory_space<vmem>>, vector<8x32xf32>,
    %c0_i32_51 = arith.constant 0 : i32
    %109 = arith.cmpi eq, %arg1, %c0_i32_51 : i32
    %110 = arith.extui %109 : i1 to i32
    %c0_i32_52 = arith.constant 0 : i32
    %111 = arith.cmpi ne, %110, %c0_i32_52 : i32
    scf.if %111 {
      %112 = arith.index_cast %9 : i32 to index
      %c0_53 = arith.constant 0 : index
      %113 = vector.load %arg16[%112, %c0_53] : memref<8x32xf32, #tpu.memory_space<vmem>>, vector<8x32xf32>
      %c0_54 = arith.constant 0 : index
      %c0_55 = arith.constant 0 : index
      %114 = vector.load %arg11[%c0_54, %c0_55] : memref<1x32xf32, #tpu.memory_space<vmem>>, vector<1x32xf32>
      %115 = vector.broadcast %114 : vector<1x32xf32> to vector<8x32xf32>
      %116 = arith.addf %113, %115 : vector<8x32xf32>
      %c0_56 = arith.constant 0 : index
      %117 = arith.index_cast %9 : i32 to index
      %c0_57 = arith.constant 0 : index
      %118 = vector.load %arg12[%c0_56, %117, %c0_57] : memref<1x8x32xf32, #tpu.memory_space<vmem>>, vector<1x8x32xf32>
      %119 = vector.shape_cast %118 : vector<1x8x32xf32> to vector<8x32xf32>
      %120 = vector.shape_cast %116 : vector<8x32xf32> to vector<1x8x32xf32>
      tpu.vector_store %arg12[%c0_56, %117, %c0_57], %120 {strides = array<i32>} : memref<1x8x32xf32, #tpu.memory_space<vmem>>, vector<1x8x32xf32>,
    } else {
    }
    return
  }
  func.func @transform_0(%arg0: i32, %arg1: i32, %arg2: i32) -> (i32, i32, i32) {
    %c0_i32 = arith.constant 0 : i32
    %c0_i32_0 = arith.constant 0 : i32
    %c0_i32_1 = arith.constant 0 : i32
    return %arg0, %c0_i32, %c0_i32_0 : i32, i32, i32
  }
  func.func @transform_1(%arg0: i32, %arg1: i32, %arg2: i32) -> (i32, i32, i32) {
    %c0_i32 = arith.constant 0 : i32
    %c0_i32_0 = arith.constant 0 : i32
    %c0_i32_1 = arith.constant 0 : i32
    return %arg1, %c0_i32, %c0_i32_0 : i32, i32, i32
  }
  func.func @transform_2(%arg0: i32, %arg1: i32, %arg2: i32) -> (i32, i32, i32) {
    %c0_i32 = arith.constant 0 : i32
    %c0_i32_0 = arith.constant 0 : i32
    %c0_i32_1 = arith.constant 0 : i32
    return %arg1, %c0_i32, %c0_i32_0 : i32, i32, i32
  }
  func.func @transform_3(%arg0: i32, %arg1: i32, %arg2: i32) -> (i32, i32, i32) {
    %c0_i32 = arith.constant 0 : i32
    %c0_i32_0 = arith.constant 0 : i32
    %c0_i32_1 = arith.constant 0 : i32
    return %arg1, %c0_i32, %c0_i32_0 : i32, i32, i32
  }
  func.func @transform_4(%arg0: i32, %arg1: i32, %arg2: i32) -> (i32, i32, i32) {
    %c0_i32 = arith.constant 0 : i32
    %c0_i32_0 = arith.constant 0 : i32
    %c0_i32_1 = arith.constant 0 : i32
    return %arg1, %c0_i32, %c0_i32_0 : i32, i32, i32
  }
  func.func @transform_5(%arg0: i32, %arg1: i32, %arg2: i32) -> (i32, i32, i32) {
    %c0_i32 = arith.constant 0 : i32
    %c0_i32_0 = arith.constant 0 : i32
    %c0_i32_1 = arith.constant 0 : i32
    return %arg1, %c0_i32, %c0_i32_0 : i32, i32, i32
  }
  func.func @transform_6(%arg0: i32, %arg1: i32, %arg2: i32) -> (i32, i32, i32) {
    %c0_i32 = arith.constant 0 : i32
    %c0_i32_0 = arith.constant 0 : i32
    %c0_i32_1 = arith.constant 0 : i32
    return %arg1, %c0_i32, %c0_i32_0 : i32, i32, i32
  }
  func.func @transform_7(%arg0: i32, %arg1: i32, %arg2: i32) -> (i32, i32, i32) {
    %c0_i32 = arith.constant 0 : i32
    %c0_i32_0 = arith.constant 0 : i32
    %c0_i32_1 = arith.constant 0 : i32
    return %arg1, %c0_i32, %c0_i32_0 : i32, i32, i32
  }
  func.func @transform_8(%arg0: i32, %arg1: i32, %arg2: i32) -> (i32, i32) {
    %c0_i32 = arith.constant 0 : i32
    %c0_i32_0 = arith.constant 0 : i32
    %c0_i32_1 = arith.constant 0 : i32
    return %c0_i32, %c0_i32_0 : i32, i32
  }
  func.func @transform_9(%arg0: i32, %arg1: i32, %arg2: i32) -> (i32, i32, i32) {
    %c0_i32 = arith.constant 0 : i32
    %c0_i32_0 = arith.constant 0 : i32
    %c0_i32_1 = arith.constant 0 : i32
    return %arg0, %c0_i32, %c0_i32_0 : i32, i32, i32
  }
  func.func @transform_10(%arg0: i32, %arg1: i32, %arg2: i32) -> (i32, i32, i32, i32) {
    %c0_i32 = arith.constant 0 : i32
    %c0_i32_0 = arith.constant 0 : i32
    return %arg0, %arg1, %arg2, %c0_i32 : i32, i32, i32, i32
  }
}

</mosaic_0001>

<bundles_post_ra>
// kernel: tpu_custom_call.1
= control target key start
LH: loop header
LB: loop body
LE: loop exit
PB: predicated region body
PF: predicated region fallthrough
CT: control target
= control target key end

     0   :  { %s2970_s0 = inlined_call_operand.hbm [shape: f32[2,8,32], index: 0, kind: input, shape index: {}]   ;;  %s2971_s1 = inlined_call_operand.hbm [shape: f32[1,32,32], index: 1, kind: input, shape index: {}]   ;;  %s2972_s2 = inlined_call_operand.vmem [shape: f32[1,1,32], index: 2, kind: input, shape index: {}]   ;;  %s2973_s3 = inlined_call_operand.hbm [shape: f32[1,32,32], index: 3, kind: input, shape index: {}]   ;;  %s2974_s4 = inlined_call_operand.vmem [shape: f32[1,1,32], index: 4, kind: input, shape index: {}]   ;;  %s2975_s5 = inlined_call_operand.hbm [shape: f32[1,32,32], index: 5, kind: input, shape index: {}]   ;;  %s2976_s6 = inlined_call_operand.vmem [shape: f32[1,1,32], index: 6, kind: input, shape index: {}]   ;;  %s2977_s7 = inlined_call_operand.hbm [shape: f32[1,32,32], index: 7, kind: input, shape index: {}]   ;;  %s2978_s8 = inlined_call_operand.vmem [shape: f32[1,32], index: 8, kind: input, shape index: {}]   ;;  %s2979_s9 = inlined_call_operand.hbm [shape: f32[2,8,32], index: 9, kind: output, shape index: {0}]   ;;  %s2980_s10 = inlined_call_operand.hbm [shape: bf16[2,4,8,8], index: 10, kind: output, shape index: {1}]  }
   0x1   :  { %2989 = sst [smem:[#allocation23_spill]] %s2970_s0 }
   0x2   :  { %2990 = sst [smem:[#allocation24_spill]] %s2971_s1 }
   0x3   :  { %2991 = sst [smem:[#allocation25_spill]] %s2972_s2 }
   0x4   :  { %2992 = sst [smem:[#allocation26_spill]] %s2978_s8 }
   0x5   :  { %2993 = sst [smem:[#allocation27_spill]] %s2979_s9 }
   0x6   :  { %2994 = sst [smem:[#allocation28_spill]] %s2980_s10 }
   0x7   :  { %16 = vsyncpa [#allocation6], 0 }
   0x8   :  { %18 = vsyncpa [#allocation6 + $0x1], 0 }
   0x9   :  { %19 = vsyncpa [#allocation9], 0 }
   0xa   :  { %20 = vsyncpa [#allocation12], 0 }
   0xb   :  { %21 = vsyncpa [#allocation7], 0 }
   0xc   :  { %23 = vsyncpa [#allocation7 + $0x1], 0 }
   0xd   :  { %24 = vsyncpa [#allocation16], 0 }
   0xe   :  { %26 = vsyncpa [#allocation16 + $0x1], 0  ;;  %s2511_s13 = smov 0   ;;  %s2513_s14 = smov 0  }
   0xf   :  { %s2515_s15 = smov 0   ;;  %s2517_s16 = smov 0  }
  0x10   :  { %s2519_s17 = smov 0   ;;  %s2521_s18 = smov 0  }
  0x11 LB: > { %2995 = sst [smem:[#allocation22_spill]] %s2426_s16  ;;  %s2981_s19 = sadd.s32 4294967295, %s2434_s18   ;;  %s2434_s18 = sphi %s2521_s18, %s32_s18   ;;  %s2430_s17 = sphi %s2519_s17, %s3023_s17   ;;  %s2426_s16 = sphi %s2517_s16, %s3022_s16   ;;  %s2422_s15 = sphi %s2515_s15, %s3021_s15   ;;  %s2418_s14 = sphi %s2513_s14, %s3020_s14   ;;  %s2414_s13 = sphi %s2511_s13, %s3019_s13  }
  0x12   : > { %p1839_p0 = scmp.ge.s32.totalorder %s2434_s18, 1  ;;  %p2545_p1 = scmp.eq.s32.totalorder %s2981_s19, 0 }
  0x13   : > { %p341_p2 = scmp.lt.s32.totalorder %s2434_s18, 3  ;;  %s2436_s22 = smov [#allocation8]  }
  0x14   : > { %s2996_s20 = scalar_select %p2545_p1, 1, 0 }
  0x15   : > { %p2550_p3 = pnand %p1839_p0, %p341_p2  ;;  %s356_s23 = sshll.u32 %s2436_s22, 4  ;;  %s2554_s23 = int_to_ptr.vmem [resolvable:$true] %s356_s23 }
  0x16   : > { %s2437_s25 = smov [#allocation11]   ;;  %s2438_s27 = smov [#allocation10]  }
  0x17   : > { %s2997_s21 = scalar_select %p2550_p3, 1, 0 }
  0x18   : > { %p2055_p4 = pneg %p2550_p3  ;;  %s400_s26 = sshll.u32 %s2437_s25, 4  ;;  %s2565_s26 = int_to_ptr.vmem [resolvable:$true] %s400_s26 }
  0x19   : > { %s2567_s28 = sshll.u32 %s2438_s27, 4  ;;  %s2999_s1 = sld [smem:[#allocation24_spill]]  ;;  %s379_s28 = int_to_ptr.vmem [resolvable:$true] %s2567_s28 }
  0x1a   : > { %p2561_p6 = pnand %p2055_p4, %p2545_p1 }
  0x1c   : > { %p2577_p8 = pneg %p2561_p6 }
  0x1f   : > { %s2170_s11 = scalar_lea.hbm %s2999_s1, 512 }
  0x20   : > { %p2171_p7 = scmp.ne.s32.totalorder %s2999_s1, %s2170_s11  ;;  %p2177_p11 = scmp.lt.u32.totalorder %s2170_s11, %s2999_s1 }
  0x22   : > { %p2173_p9 = pnand %p2577_p8, %p2171_p7 }
  0x24   : > { %p2174_p10 = pneg %p2173_p9 }
  0x26   : > { %p2179_p12 = pnand %p2177_p11, %p2174_p10 }
  0x28   : > { %2182 = shalt.err (!%p2179_p12)
}
  0x29   : > { %s2183_s29 = scalar_lea.vmem %s2554_s23, 512  ;;  %p2191_p4 = scmp.lt.s32.totalorder %s2554_s23, %s2554_s23 }
  0x2a   : > { %p2184_p13 = scmp.ne.s32.totalorder %s2554_s23, %s2183_s29  ;;  %p2192_p5 = scmp.lt.s32.totalorder %s2183_s29, %s2183_s29 }
  0x2c   : > { %p2186_p0 = pnand %p2184_p13, %p2577_p8  ;;  %p2193_p7 = por %p2192_p5, %p2191_p4 }
  0x2e   : > { %p2187_p2 = pneg %p2186_p0 }
  0x30   : > { %p2194_p9 = pnand %p2193_p7, %p2187_p2 }
  0x32   : > { %2197 = shalt.err (!%p2194_p9)
}
  0x33   : > { %s2439_s30 = smov 128   ;;  %s2440_s11 = smov 8  }
  0x34   : > { %2058 = dma.hbm_to_vmem [thread:$0]  (!%p2561_p6), %s2999_s1, 512, %s2554_s23, [#allocation9], %s2439_s30, %s2439_s30, %s2440_s11  }
  0x35   : > { %s2198_s29 = scalar_lea.hbm %s2975_s5, 512 }
  0x36   : > { %p2199_p5 = scmp.ne.s32.totalorder %s2975_s5, %s2198_s29  ;;  %p2205_p12 = scmp.lt.u32.totalorder %s2198_s29, %s2975_s5 }
  0x38   : > { %p2201_p10 = pnand %p2199_p5, %p2577_p8 }
  0x3a   : > { %p2202_p11 = pneg %p2201_p10 }
  0x3c   : > { %p2207_p13 = pnand %p2205_p12, %p2202_p11 }
  0x3e   : > { %2210 = shalt.err (!%p2207_p13)
}
  0x3f   : > { %s2211_s23 = scalar_lea.vmem %s2565_s26, 512  ;;  %p2219_p7 = scmp.lt.s32.totalorder %s2565_s26, %s2565_s26 }
  0x40   : > { %p2212_p0 = scmp.ne.s32.totalorder %s2565_s26, %s2211_s23  ;;  %p2220_p9 = scmp.lt.s32.totalorder %s2211_s23, %s2211_s23 }
  0x42   : > { %p2214_p2 = pnand %p2212_p0, %p2577_p8  ;;  %p2221_p5 = por %p2220_p9, %p2219_p7 }
  0x44   : > { %p2215_p4 = pneg %p2214_p2 }
  0x46   : > { %p2222_p10 = pnand %p2221_p5, %p2215_p4 }
  0x48   : > { %2225 = shalt.err (!%p2222_p10)
}
  0x49   : > { %2064 = dma.hbm_to_vmem [thread:$0]  (!%p2561_p6), %s2975_s5, 512, %s2565_s26, [#allocation12], %s2439_s30, %s2439_s30, %s2440_s11  }
  0x4a   : > { %s2226_s12 = scalar_lea.hbm %s2973_s3, 512 }
  0x4b   : > { %p2227_p11 = scmp.ne.s32.totalorder %s2973_s3, %s2226_s12  ;;  %p2233_p0 = scmp.lt.u32.totalorder %s2226_s12, %s2973_s3 }
  0x4d   : > { %p2229_p12 = pnand %p2227_p11, %p2577_p8 }
  0x4f   : > { %p2230_p13 = pneg %p2229_p12 }
  0x51   : > { %p2235_p2 = pnand %p2233_p0, %p2230_p13 }
  0x53   : > { %2238 = shalt.err (!%p2235_p2)
}
  0x54   : > { %s2239_s23 = scalar_lea.vmem %s379_s28, 512  ;;  %p2247_p5 = scmp.lt.s32.totalorder %s379_s28, %s379_s28 }
  0x55   : > { %p2240_p4 = scmp.ne.s32.totalorder %s379_s28, %s2239_s23  ;;  %p2248_p10 = scmp.lt.s32.totalorder %s2239_s23, %s2239_s23 }
  0x57   : > { %p2242_p7 = pnand %p2240_p4, %p2577_p8  ;;  %p2249_p3 = por %p2248_p10, %p2247_p5 }
  0x59   : > { %p2243_p9 = pneg %p2242_p7 }
  0x5b   : > { %p2250_p1 = pnand %p2249_p3, %p2243_p9 }
  0x5d   : > { %2253 = shalt.err (!%p2250_p1)
}
  0x5e   : > { %2061 = dma.hbm_to_vmem [thread:$0]  (!%p2561_p6), %s2973_s3, 512, %s379_s28, [#allocation9], %s2439_s30, %s2439_s30, %s2440_s11  }
  0x5f   : > { %s2441_s9 = smov [#allocation13]   ;;  %s2254_s22 = scalar_lea.hbm %s2977_s7, 512 }
  0x60   : > { %s422_s10 = sshll.u32 %s2441_s9, 4  ;;  %p2255_p1 = scmp.ne.s32.totalorder %s2977_s7, %s2254_s22  ;;  %s423_s10 = int_to_ptr.vmem [resolvable:$true] %s422_s10 }
  0x61   : > { %p2261_p12 = scmp.lt.u32.totalorder %s2254_s22, %s2977_s7 }
  0x62   : > { %p2257_p3 = pnand %p2255_p1, %p2577_p8 }
  0x64   : > { %p2258_p11 = pneg %p2257_p3 }
  0x66   : > { %p2263_p13 = pnand %p2261_p12, %p2258_p11 }
  0x68   : > { %2266 = shalt.err (!%p2263_p13)
}
  0x69   : > { %s2267_s28 = scalar_lea.vmem %s423_s10, 512  ;;  %p2275_p7 = scmp.lt.s32.totalorder %s423_s10, %s423_s10 }
  0x6a   : > { %p2268_p0 = scmp.ne.s32.totalorder %s423_s10, %s2267_s28  ;;  %p2276_p9 = scmp.lt.s32.totalorder %s2267_s28, %s2267_s28 }
  0x6c   : > { %p2270_p2 = pnand %p2268_p0, %p2577_p8  ;;  %p2277_p5 = por %p2276_p9, %p2275_p7 }
  0x6e   : > { %p2271_p4 = pneg %p2270_p2 }
  0x70   : > { %p2278_p10 = pnand %p2277_p5, %p2271_p4 }
  0x72   : > { %2281 = shalt.err (!%p2278_p10)
}
  0x73   : > { %2067 = dma.hbm_to_vmem [thread:$0]  (!%p2561_p6), %s2977_s7, 512, %s423_s10, [#allocation12], %s2439_s30, %s2439_s30, %s2440_s11  }
  0x74   : > { %s1838_s19 = sadd.s32 4294967294, %s2434_s18   ;;  %s51_s24 = sadd.s32 1, %s2430_s17 }
  0x75   : > { %p53_p8 = scmp.ge.s32.totalorder %s51_s24, 2  ;;  %s58_s9 = sadd.s32 1, %s2422_s15 }
  0x76   : > { %p65_p1 = scmp.ne.s32.totalorder %s2422_s15, %s2418_s14  ;;  %p66_p3 = scmp.eq.s32.totalorder %s2434_s18, 0 }
  0x77   : > { %s3025_s24 = smov (%p53_p8, %s51_s24), 0  ;;  %p71_p12 = scmp.ne.s32.totalorder %s2418_s14, %s2414_s13 }
  0x78   : > { %p2678_p11 = por %p66_p3, %p65_p1  ;;  %s55_s30 = ssub.s32 %s2430_s17, %s3025_s24 }
  0x79   : > { %s3002_s11 = sadd.s32 4294967295, %s2434_s18   ;;  %p56_p13 = scmp.eq.s32.totalorder %s55_s30, 0 }
  0x7a   : > { %p298_p6 = scmp.eq.s32.totalorder %s3002_s11, 1  ;;  %p3003_p0 = scmp.ne.s32.totalorder %s2996_s20, 0 }
  0x7b   : > { %p304_p7 = scmp.eq.s32.totalorder %s1838_s19, 1  ;;  %p2083_p5 = scmp.lt.s32.totalorder %s2434_s18, 2 }
  0x7c   : > { %p2690_p2 = por %p3003_p0, %p71_p12  ;;  %p2694_p4 = por %p298_p6, %p65_p1 }
  0x7d   : > { %s2699_s22 = scalar_select %p56_p13, %s2422_s15, %s58_s9  }
  0x7e   : > { %s3005_s12 = scalar_select %p2694_p4, 1, 0 }
  0x7f   : > { %p2701_p9 = por %p304_p7, %p71_p12  ;;  %s439_s27 = sand.u32 1, %s2422_s15  }
  0x80   : > { %s1849_s29 = sshll.u32 %s2430_s17, 7  ;;  %s1848_s23 = sshll.u32 %s439_s27, 3 }
  0x81   : > { %s3006_s25 = scalar_select %p2701_p9, 1, 0 }
  0x82   : > { %s3007_s0 = sld [smem:[#allocation23_spill]]  ;;  %s443_s19 = scalar_lea.vmem [#allocation5], %s1848_s23 }
  0x83   : > { %s450_s9 = sshll.u32 %s443_s19, 4  ;;  %p2715_p10 = pnand %p2083_p5, %p2678_p11  ;;  %s2719_s9 = int_to_ptr.vmem [resolvable:$true] %s450_s9 }
  0x84   : > { %s440_s11 = scalar_lea.sflag [#allocation6], %s439_s27 }
  0x85   : > { %p2284_p1 = pneg %p2715_p10 }
  0x88   : > { %s2711_s8 = scalar_lea.hbm %s3007_s0, %s1849_s29  ;;  %s2287_s16 = scalar_lea.hbm %s3007_s0, 256 }
  0x89   : > { %s2282_s1 = scalar_lea.hbm %s2711_s8, 128  ;;  %p2288_p11 = scmp.lt.u32.totalorder %s2711_s8, %s3007_s0 }
  0x8a   : > { %p2283_p8 = scmp.ne.s32.totalorder %s2711_s8, %s2282_s1  ;;  %p2289_p6 = scmp.lt.u32.totalorder %s2287_s16, %s2282_s1 }
  0x8b   : > { %p2291_p0 = scmp.lt.u32.totalorder %s2282_s1, %s2711_s8 }
  0x8c   : > { %p2285_p3 = pnand %p2284_p1, %p2283_p8  ;;  %p2290_p13 = por %p2289_p6, %p2288_p11 }
  0x8e   : > { %p2286_p12 = pneg %p2285_p3  ;;  %p2292_p7 = por %p2291_p0, %p2290_p13 }
  0x90   : > { %p2293_p5 = pnand %p2292_p7, %p2286_p12 }
  0x92   : > { %2296 = shalt.err (!%p2293_p5)
}
  0x93   : > { %s2297_s27 = scalar_lea.vmem %s2719_s9, 128  ;;  %s2442_s19 = smov [#allocation5]  }
  0x94   : > { %p2298_p8 = scmp.ne.s32.totalorder %s2719_s9, %s2297_s27  ;;  %s2302_s29 = sshll.u32 %s2442_s19, 4  ;;  %s2303_s29 = int_to_ptr.vmem [resolvable:$false] %s2302_s29 }
  0x95   : > { %s2304_s23 = scalar_lea.vmem %s2303_s29, 256  ;;  %p2305_p4 = scmp.lt.s32.totalorder %s2719_s9, %s2303_s29 }
  0x96   : > { %p2300_p3 = pnand %p2298_p8, %p2284_p1  ;;  %p2306_p11 = scmp.lt.s32.totalorder %s2304_s23, %s2297_s27 }
  0x98   : > { %p2301_p9 = pneg %p2300_p3  ;;  %p2307_p6 = por %p2306_p11, %p2305_p4 }
  0x9a   : > { %p2308_p13 = pnand %p2307_p6, %p2301_p9 }
  0x9c   : > { %2311 = shalt.err (!%p2308_p13)
}
  0x9d   : > { %2071 = dma.hbm_to_vmem [thread:$0]  (!%p2715_p10), %s2711_s8, 128, %s2719_s9, %s440_s11  }
  0x9e   : > { %p3009_p12 = scmp.ne.s32.totalorder %s2997_s21, 0 }
  0x9f   : > { %s2749_s1 = sand.u32 (!%p3009_p12), 1, %s2418_s14  }
  0xa0   : > { %459 = sbr.rel (%p3009_p12) target bundleno = 2096 (0x830), region = 56  ;;  %s1851_s16 = sshll.u32 (!%p3009_p12), %s2749_s1, 3 }
  0xa1   : > { %s462_s28 = scalar_lea.sflag (!%p3009_p12), [#allocation6], %s2749_s1  ;;  %s2755_s26 = scalar_lea.vmem (!%p3009_p12), [#allocation5], %s1851_s16 }
  0xa7   : > { %2393 = dma.done.wait (%p2690_p2), %s462_s28, 128  }
  0xa8   : > { %2395 = vsyncadd (%p2690_p2), %s462_s28, 4294967168  ;;  %p3010_p4 = scmp.ne.s32.totalorder %s2996_s20, 0 }
  0xaa   : > { %2397 = dma.done.wait (%p3010_p4), [#allocation9], 1024  }
  0xab   : > { %2399 = vsyncadd (%p3010_p4), [#allocation9], 4294966272 }
  0xac   : > { %2401 = dma.done.wait (%p3010_p4), [#allocation12], 1024  }
  0xad   : > { %2403 = vsyncadd (%p3010_p4), [#allocation12], 4294966272  ;;  %vm558_vm0 = vcmask 261120   ;;  %v2443_v0 = vmov 0.0|0.0   ;;  %vm2444_vm1 = vmmov 0   ;;  %v2445_v1 = vmov 0.0  }
  0xae   : > { %2009 = vmatprep.subr.bf16.mxu0 %v2443_v0  ;;  %1933 = vmatprep.mubr.msk.f32.mxu0 %vm2444_vm1, %v2445_v1  ;;  %721 = vst.msk [vmem:[#allocation4] sm:$0xff] %vm558_vm0, %v2445_v1  ;;  %v547_v2 = vld [vmem:[#allocation10] sm:$0xff]  ;;  %v548_v3 = vld [vmem:[#allocation10 + $0x8] sm:$0xff]  ;;  %v549_v4 = vld [vmem:[#allocation10 + $0x10] sm:$0xff]  ;;  %s3011_s2 = sld [smem:[#allocation25_spill]]  ;;  %vm813_vm2 = vcmask 64512  }
  0xaf   : > { %2015 = vmatprep.subr.bf16.mxu1 %v2443_v0  ;;  %1944 = vmatprep.mubr.msk.f32.mxu1 %vm2444_vm1, %v2445_v1  ;;  %v2010_v5 = vpack.c.bf16 %v548_v3, %v547_v2  ;;  %v550_v6 = vld [vmem:[#allocation10 + $0x18] sm:$0xff]  ;;  %v633_v8 = vld [vmem:[#allocation11] sm:$0xff]  ;;  %v634_v9 = vld [vmem:[#allocation11 + $0x8] sm:$0xff]  ;;  %s2446_s9 = smov 120   ;;  %s2447_s30 = smov 112   ;;  %vm902_vm3 = vcmask 60416  }
  0xb0   : > { %v2013_v7 = vpack.c.bf16 %v550_v6, %v549_v4  ;;  %v725_v10 = vld [vmem:[#allocation8] sm:$0xff]  ;;  %v726_v11 = vld [vmem:[#allocation8 + $0x8] sm:$0xff]  ;;  %v2016_v12 = vpack.c.bf16 %v634_v9, %v633_v8  ;;  %v546_v13 = vld [vmem:[%s2755_s26] sm:$0xff]  ;;  %s2448_s11 = smov 104   ;;  %s1857_s29 = sshll.u32 %s2749_s1, 4  ;;  %vm1495_vm4 = vcmask 130048  }
  0xb1   : > { %2011 = vmatpush3.bf16.msra.mxu0 %v2010_v5  ;;  %v2022_v14 = vpack.c.bf16 %v726_v11, %v725_v10  ;;  %v727_v15 = vld [vmem:[#allocation8 + $0x10] sm:$0xff]  ;;  %v728_v16 = vld [vmem:[#allocation8 + $0x18] sm:$0xff]  ;;  %s2836_s23 = scalar_lea.vmem [#allocation15], %s1857_s29  ;;  %s2449_s28 = smov 8   ;;  %vm1497_vm5 = vcmask 195584  }
  0xb2   : > { %2012 = vmatprep.subr.bf16.mxu0 %v2443_v0  ;;  %2017 = vmatpush3.bf16.msra.mxu1 %v2016_v12  ;;  %v2025_v17 = vpack.c.bf16 %v728_v16, %v727_v15  ;;  %v635_v18 = vld [vmem:[#allocation11 + $0x10] sm:$0xff]  ;;  %v636_v19 = vld [vmem:[#allocation11 + $0x18] sm:$0xff]  ;;  %s2450_s26 = smov 16   ;;  %s3012_s20 = sld [smem:[#allocation22_spill]] }
  0xb3   : > { %2018 = vmatprep.subr.bf16.mxu1 %v2443_v0  ;;  %v2019_v20 = vpack.c.bf16 %v636_v19, %v635_v18  ;;  %v1858_v21 = vld [vmem:[%s2974_s4] ss:$0 sm:$0xff]  ;;  %s2451_s21 = smov 24   ;;  %s1629_s8 = sshll.u32 %s2836_s23, 4  ;;  %s2884_s8 = int_to_ptr.vmem [resolvable:$true] %s1629_s8 }
  0xb4   : > { %v1862_v25 = vld [vmem:[%s3011_s2] ss:$0 sm:$0xff]  ;;  %s1600_s19 = scalar_lea.sflag [#allocation16], %s2749_s1  ;;  %s2312_s29 = scalar_lea.vmem %s2884_s8, 256 }
  0xb5   : > { %2014 = vmatpush3.bf16.msra.mxu0 %v2013_v7  ;;  %v1860_v31 = vld [vmem:[%s2976_s6] ss:$0 sm:$0xff]  ;;  %p2313_p2 = scmp.ne.s32.totalorder %s2884_s8, %s2312_s29  ;;  %p3014_p9 = scmp.ne.s32.totalorder %s3005_s12, 0 }
  0xb6   : > { %2021 = vmatprep.subr.bf16.mxu0 %v2443_v0  ;;  %2020 = vmatpush3.bf16.msra.mxu1 %v2019_v20 }
  0xb7   : > { %1958 = vmatprep.subr.mxu1 %v2445_v1  ;;  %p2314_p10 = pnand %p2313_p2, %p3014_p9 }
  0xb8   : > { %1934 = vmatmul.mubr.msk.f32.vlgmr.msra.gmra.mrb[0].mxu0 %vm558_vm0, %v546_v13  ;;  %s1888_s10 = sshll.u32 %s3012_s20, 8 }
  0xb9   : > { %2023 = vmatpush3.bf16.msra.mxu0 %v2022_v14  ;;  %1955 = vmatprep.mubr.msk.f32.mxu0 %vm2444_vm1, %v2445_v1  ;;  %p2315_p1 = pneg %p2314_p10 }
  0xba   : > { %2024 = vmatprep.subr.bf16.mxu0 %v2443_v0  ;;  %1945 = vmatmul.mubr.msk.f32.vlgmr.msra.gmra.mrb[0].mxu1 %vm558_vm0, %v546_v13 }
  0xbb   : > { %1960 = vmatprep.mubr.msk.f32.mxu1 %vm2444_vm1, %v2445_v1 }
  0xbd   : > { %2026 = vmatpush3.bf16.msra.mxu0 %v2025_v17 }
  0xbe   : > { %1978 = vmatprep.subr.mxu0 %v2445_v1 }
  0xc0   : > { %1956 = vmatmul.mubr.msk.f32.vlgmr.msra.gmra.mrb[2].mxu0 %vm558_vm0, %v546_v13 }
  0xc1   : > { %1980 = vmatprep.mubr.msk.f32.mxu0 %vm2444_vm1, %v2445_v1 }
 0x18b   : > { %v628_v22 = vpop.f32.mrb[0].mxu0 }
 0x18c   : > { %v629_v23 = vadd.f32 %v1858_v21, %v628_v22  ;;  %v1935_v24 = vpop.f32.mrb[1].mxu0 }
 0x18d   : > { %v710_v32 = vpop.f32.mrb[0].mxu1 }
 0x18e   : > { %632 = vst.msk [vmem:[#allocation2] sm:$0xff] %vm558_vm0, %v629_v23  ;;  %v711_v33 = vadd.f32 %v1860_v31, %v710_v32  ;;  %v1946_v34 = vpop.f32.mrb[1].mxu1 }
 0x18f   : > { %v1500_v34 = vld [vmem:[#allocation13 + $0x8] sm:$0xff] }
 0x190   : > { %714 = vst.msk [vmem:[#allocation3] sm:$0xff] %vm558_vm0, %v711_v33  ;;  %v1499_v33 = vld [vmem:[#allocation13] sm:$0xff] }
 0x193   : > { %v806_v26 = vpop.f32.mrb[2].mxu0 }
 0x194   : > { %v807_v27 = vadd.f32 %v1862_v25, %v806_v26  ;;  %v1957_v28 = vpop.f32.mrb[3].mxu0 }
 0x195   : > { %v811_v29 = vld [vmem:[#allocation2] sm:$0xff] }
 0x196   : > { %v810_v30 = vmul.f32 0.35355338, %v807_v27  ;;  %979 = vrot.lane.b32.xlu1 %v811_v29, %s2446_s9  ;;  %1959 = vmatpush3.xpose.msk.msra.mxu1 %vm813_vm2, %v811_v29 }
 0x197   : > { %1963 = vmatprep.subr.mxu1 %v2445_v1  ;;  %v2814_v35 = vld [vmem:[#allocation3] sm:$0xff] }
 0x199   : > { %1961 = vmatmul.mubr.msk.f32.vlgmr.msra.gmra.mrb[2].mxu1 %vm813_vm2, %v810_v30 }
 0x19a   : > { %977 = vrot.lane.b32.xlu1 %v810_v30, %s2446_s9  ;;  %1965 = vmatprep.mubr.msk.f32.mxu1 %vm2444_vm1, %v2445_v1 }
 0x19b   : > { %1964 = vmatpush3.msra.mxu1 %v2814_v35 }
 0x19c   : > { %1968 = vmatprep.subr.mxu1 %v2445_v1 }
 0x19e   : > { %1146 = vrot.lane.b32.xlu1 %v810_v30, %s2447_s30 }
 0x1a2   : > { %1316 = vrot.lane.b32.xlu1 %v811_v29, %s2448_s11 }
 0x1a6   : > { %1314 = vrot.lane.b32.xlu1 %v810_v30, %s2448_s11 }
 0x208   : > { %v980_v44 = vpop.permute.xlu1 %979 }
 0x20c   : > { %v978_v45 = vpop.permute.xlu1 %977 }
 0x210   : > { %v1147_v46 = vpop.permute.xlu1 %1146 }
 0x214   : > { %v1317_v49 = vpop.permute.xlu1 %1316 }
 0x218   : > { %v1315_v51 = vpop.permute.xlu1 %1314 }
 0x26c   : > { %v886_v36 = vpop.f32.mrb[2].mxu1 }
 0x26d   : > { %v1962_v37 = vpop.f32.mrb[3].mxu1  ;;  %v890_v38 = vsel %vm813_vm2, %v886_v36, -inf }
 0x26e   : > { %891 = vmax.xlane.f32.xlu0 %v890_v38  ;;  %v1502_v37 = vld [vmem:[#allocation13 + $0x18] sm:$0xff] }
 0x2fb   : > { %v892_v39 = vpop.xlane.xlu0 %891 }
 0x2fc   : > { %v893_v40 = vsub.f32 %v886_v36, %v892_v39  ;;  %v1501_v36 = vld [vmem:[#allocation13 + $0x10] sm:$0xff] }
 0x2fd   : > { %v2031_v38 = vpack.c.bf16 %v1502_v37, %v1501_v36 }
 0x2fe   : > { %v894_v41 = vmul.f32 1.442695, %v893_v40 }
 0x300   : > { %2154 = vpow2.f32 %v894_v41 }
 0x30a   : > { %v2155_v42 = vpop.eup %2154 }
 0x30b   : > { %v896_v43 = vsel %vm813_vm2, %v2155_v42, 0.0 }
 0x30c   : > { %897 = vadd.xlane.f32.xlu0 %v896_v43 }
 0x322   : > { %1148 = vrot.lane.b32.xlu0 %v811_v29, %s2447_s30 }
 0x399   : > { %v898_v47 = vpop.xlane.xlu0 %897 }
 0x39a   : > { %2156 = vrcp.f32 %v898_v47 }
 0x39d   : > { %v1149_v48 = vpop.permute.xlu0 %1148 }
 0x39e   : > { %1979 = vmatpush3.xpose.msk.msra.mxu0 %vm813_vm2, %v1149_v48 }
 0x39f   : > { %1988 = vmatprep.subr.mxu0 %v2445_v1 }
 0x3a1   : > { %1981 = vmatmul.mubr.msk.f32.vlgmr.msra.gmra.mrb[4].mxu0 %vm813_vm2, %v1147_v46 }
 0x3a2   : > { %1989 = vmatpush3.xpose.msk.msra.mxu0 %vm813_vm2, %v1317_v49  ;;  %1990 = vmatprep.mubr.msk.f32.mxu0 %vm2444_vm1, %v2445_v1 }
 0x3a3   : > { %2027 = vmatprep.subr.bf16.mxu0 %v2443_v0 }
 0x3a4   : > { %v2157_v50 = vpop.eup %2156 }
 0x3a5   : > { %v900_v52 = vmul.f32 %v2157_v50, %v2155_v42  ;;  %1991 = vmatmul.mubr.msk.f32.vlgmr.msra.gmra.mrb[6].mxu0 %vm813_vm2, %v1315_v51 }
 0x3a6   : > { %2006 = vmatprep.mubr.msk.f32.mxu0 %vm2444_vm1, %v2445_v1 }
 0x3a7   : > { %v901_v53 = vpack.c.bf16 %v900_v52, %v900_v52  ;;  %1966 = vmatmul.mubr.msk.f32.vlgmr.msra.gmra.mrb[4].mxu1 %vm813_vm2, %v900_v52 }
 0x3a8   : > { %1969 = vmatpush3.xpose.msk.msra.mxu1 %vm813_vm2, %v980_v44  ;;  %1970 = vmatprep.mubr.msk.f32.mxu1 %vm2444_vm1, %v2445_v1 }
 0x3a9   : > { %903 = vst.msk [vmem:[%s2836_s23] sm:$0xf] %vm902_vm3, %v901_v53  ;;  %1973 = vmatprep.subr.mxu1 %v2445_v1 }
 0x3ab   : > { %1971 = vmatmul.mubr.msk.f32.vlgmr.msra.gmra.mrb[6].mxu1 %vm813_vm2, %v978_v45 }
 0x3ac   : > { %1975 = vmatprep.mubr.msk.f32.mxu1 %vm2444_vm1, %v2445_v1 }
 0x474   : > { %v1220_v54 = vpop.f32.mrb[4].mxu0 }
 0x475   : > { %v1982_v55 = vpop.f32.mrb[5].mxu0  ;;  %v1224_v56 = vsel %vm813_vm2, %v1220_v54, -inf }
 0x476   : > { %1225 = vmax.xlane.f32.xlu0 %v1224_v56 }
 0x478   : > { %v1388_v57 = vpop.f32.mrb[6].mxu0 }
 0x479   : > { %v1992_v58 = vpop.f32.mrb[7].mxu0  ;;  %v1392_v2 = vsel %vm813_vm2, %v1388_v57, -inf }
 0x47a   : > { %v2845_v59 = vpop.f32.mrb[4].mxu1 }
 0x47b   : > { %v1967_v60 = vpop.f32.mrb[5].mxu1 }
 0x47e   : > { %v1051_v61 = vpop.f32.mrb[6].mxu1 }
 0x47f   : > { %v1972_v62 = vpop.f32.mrb[7].mxu1  ;;  %v1055_v63 = vsel %vm813_vm2, %v1051_v61, -inf }
 0x480   : > { %1056 = vmax.xlane.f32.xlu1 %v1055_v63 }
 0x484   : > { %1393 = vmax.xlane.f32.xlu1 %v1392_v2 }
 0x503   : > { %v1226_v3 = vpop.xlane.xlu0 %1225 }
 0x504   : > { %v1227_v4 = vsub.f32 %v1220_v54, %v1226_v3 }
 0x506   : > { %v1228_v5 = vmul.f32 1.442695, %v1227_v4 }
 0x508   : > { %2158 = vpow2.f32 %v1228_v5 }
 0x50d   : > { %v1057_v6 = vpop.xlane.xlu1 %1056 }
 0x50e   : > { %v1058_v14 = vsub.f32 %v1051_v61, %v1057_v6 }
 0x510   : > { %v1059_v15 = vmul.f32 1.442695, %v1058_v14 }
 0x511   : > { %v1394_v7 = vpop.xlane.xlu1 %1393 }
 0x512   : > { %v2159_v8 = vpop.eup %2158  ;;  %v1395_v9 = vsub.f32 %v1388_v57, %v1394_v7 }
 0x513   : > { %v1230_v10 = vsel %vm813_vm2, %v2159_v8, 0.0 }
 0x514   : > { %v1396_v11 = vmul.f32 1.442695, %v1395_v9  ;;  %1231 = vadd.xlane.f32.xlu0 %v1230_v10 }
 0x516   : > { %2160 = vpow2.f32 %v1396_v11 }
 0x517   : > { %2162 = vpow2.f32 %v1059_v15 }
 0x520   : > { %v2161_v12 = vpop.eup %2160 }
 0x521   : > { %v1398_v13 = vsel %vm813_vm2, %v2161_v12, 0.0  ;;  %v2163_v16 = vpop.eup %2162 }
 0x522   : > { %1399 = vadd.xlane.f32.xlu1 %v1398_v13  ;;  %v1061_v17 = vsel %vm813_vm2, %v2163_v16, 0.0 }
 0x52a   : > { %1070 = vrot.lane.b32.xlu0 %v2814_v35, %s2446_s9 }
 0x533   : > { %1238 = vrot.lane.b32.xlu1 %v2814_v35, %s2447_s30 }
 0x557   : > { %1062 = vadd.xlane.f32.xlu1 %v1061_v17 }
 0x568   : > { %1406 = vrot.lane.b32.xlu1 %v2814_v35, %s2448_s11  ;;  %v2028_v35 = vpack.c.bf16 %v1500_v34, %v1499_v33  ;;  %s3013_s11 = sld [smem:[#allocation28_spill]] }
 0x56a   : > { %2029 = vmatpush3.bf16.msra.mxu0 %v2028_v35 }
 0x56b   : > { %2030 = vmatprep.subr.bf16.mxu0 %v2443_v0 }
 0x56e   : > { %2032 = vmatpush3.bf16.msra.mxu0 %v2031_v38  ;;  %s2882_s27 = scalar_lea.hbm %s3013_s11, %s1888_s10 }
 0x5a1   : > { %v1232_v18 = vpop.xlane.xlu0 %1231 }
 0x5a2   : > { %2164 = vrcp.f32 %v1232_v18 }
 0x5a5   : > { %v1071_v19 = vpop.permute.xlu0 %1070 }
 0x5a6   : > { %1974 = vmatpush3.msra.mxu1 %v1071_v19 }
 0x5a7   : > { %1983 = vmatprep.subr.mxu1 %v2445_v1 }
 0x5ac   : > { %v2165_v20 = vpop.eup %2164 }
 0x5ad   : > { %v1234_v21 = vmul.f32 %v2165_v20, %v2159_v8 }
 0x5af   : > { %v1235_v22 = vpack.c.bf16 %v1234_v21, %v1234_v21  ;;  %v1400_v23 = vpop.xlane.xlu1 %1399 }
 0x5b0   : > { %2166 = vrcp.f32 %v1400_v23 }
 0x5b1   : > { %1873 = vst.msk [vmem:[%s2836_s23 + $0x8] sm:$0xf] %vm902_vm3, %v1235_v22 }
 0x5b3   : > { %v1239_v27 = vpop.permute.xlu1 %1238 }
 0x5ba   : > { %v2167_v24 = vpop.eup %2166 }
 0x5bb   : > { %v1402_v25 = vmul.f32 %v2167_v24, %v2161_v12 }
 0x5bd   : > { %v1403_v26 = vpack.c.bf16 %v1402_v25, %v1402_v25 }
 0x5bf   : > { %1877 = vst.msk [vmem:[%s2836_s23 + $0xc] sm:$0xf] %vm902_vm3, %v1403_v26 }
 0x5e4   : > { %v1063_v28 = vpop.xlane.xlu1 %1062 }
 0x5e5   : > { %2168 = vrcp.f32 %v1063_v28 }
 0x5e8   : > { %v1407_v32 = vpop.permute.xlu1 %1406 }
 0x5ef   : > { %v2169_v29 = vpop.eup %2168 }
 0x5f0   : > { %v1065_v30 = vmul.f32 %v2169_v29, %v2163_v16 }
 0x5f2   : > { %v1066_v31 = vpack.c.bf16 %v1065_v30, %v1065_v30  ;;  %1976 = vmatmul.mubr.msk.f32.vlgmr.msra.gmra.mrb[8].mxu1 %vm813_vm2, %v1065_v30 }
 0x5f3   : > { %1984 = vmatpush3.msra.mxu1 %v1239_v27  ;;  %1985 = vmatprep.mubr.msk.f32.mxu1 %vm2444_vm1, %v2445_v1 }
 0x5f4   : > { %1869 = vst.msk [vmem:[%s2836_s23 + $0x4] sm:$0xf] %vm902_vm3, %v1066_v31  ;;  %1993 = vmatprep.subr.mxu1 %v2445_v1 }
 0x5f6   : > { %1986 = vmatmul.mubr.msk.f32.vlgmr.msra.gmra.mrb[10].mxu1 %vm813_vm2, %v1234_v21 }
 0x5f7   : > { %1994 = vmatpush3.msra.mxu1 %v1407_v32  ;;  %1995 = vmatprep.mubr.msk.f32.mxu1 %vm2444_vm1, %v2445_v1 }
 0x5fa   : > { %1996 = vmatmul.mubr.msk.f32.vlgmr.msra.gmra.mrb[12].mxu1 %vm813_vm2, %v1402_v25 }
 0x6c5   : > { %v1142_v39 = vpop.f32.mrb[8].mxu1 }
 0x6c6   : > { %1483 = vrot.lane.b32.xlu0 %v1142_v39, %s2449_s28  ;;  %v1977_v40 = vpop.f32.mrb[9].mxu1  ;;  %s2452_s28 = smov [#allocation15]  }
 0x6c9   : > { %v1310_v41 = vpop.f32.mrb[10].mxu1 }
 0x6ca   : > { %1487 = vrot.lane.b32.xlu1 %v1310_v41, %s2450_s26  ;;  %v1987_v1 = vpop.f32.mrb[11].mxu1  ;;  %s2316_s26 = sshll.u32 %s2452_s28, 4  ;;  %s2317_s26 = int_to_ptr.vmem [resolvable:$false] %s2316_s26 }
 0x6cb   : > { %s2318_s23 = scalar_lea.vmem %s2317_s26, 512  ;;  %p2319_p0 = scmp.lt.s32.totalorder %s2884_s8, %s2317_s26 }
 0x6cc   : > { %p2320_p7 = scmp.lt.s32.totalorder %s2318_s23, %s2312_s29 }
 0x6cd   : > { %v1478_v42 = vpop.f32.mrb[12].mxu1 }
 0x6ce   : > { %1491 = vrot.lane.b32.xlu0 %v1478_v42, %s2451_s21  ;;  %v1997_v43 = vpop.f32.mrb[13].mxu1  ;;  %p2321_p5 = por %p2320_p7, %p2319_p0 }
 0x6d0   : > { %p2322_p8 = pnand %p2321_p5, %p2315_p1 }
 0x738   : > { %v1484_v0 = vpop.permute.xlu0 %1483 }
 0x739   : > { %v1494_v45 = vsel %vm813_vm2, %v2845_v59, %v1484_v0 }
 0x73c   : > { %v1488_v44 = vpop.permute.xlu1 %1487 }
 0x73d   : > { %v1496_v46 = vsel %vm1495_vm4, %v1494_v45, %v1488_v44 }
 0x740   : > { %v1492_v47 = vpop.permute.xlu0 %1491 }
 0x741   : > { %v1498_v48 = vsel %vm1497_vm5, %v1496_v46, %v1492_v47 }
 0x742   : > { %2007 = vmatmul.mubr.msk.f32.vlgmr.msra.gmra.mrb[8].mxu0 %vm558_vm0, %v1498_v48 }
 0x743   : > { %2325 = shalt.err (!%p2322_p8)
}
 0x744   : > { %s2326_s21 = scalar_lea.hbm %s2882_s27, 256  ;;  %s2330_s30 = scalar_lea.hbm %s3013_s11, 512 }
 0x745   : > { %p2327_p3 = scmp.ne.s32.totalorder %s2882_s27, %s2326_s21  ;;  %p2331_p13 = scmp.lt.u32.totalorder %s2882_s27, %s3013_s11 }
 0x746   : > { %p2332_p12 = scmp.lt.u32.totalorder %s2330_s30, %s2326_s21  ;;  %p2334_p2 = scmp.lt.u32.totalorder %s2326_s21, %s2882_s27 }
 0x747   : > { %p2328_p11 = pnand %p2327_p3, %p3014_p9 }
 0x748   : > { %p2333_p4 = por %p2332_p12, %p2331_p13 }
 0x749   : > { %p2329_p6 = pneg %p2328_p11 }
 0x74a   : > { %p2335_p10 = por %p2334_p2, %p2333_p4 }
 0x74c   : > { %p2336_p1 = pnand %p2335_p10, %p2329_p6 }
 0x74e   : > { %2339 = shalt.err (!%p2336_p1)
}
 0x74f   : > { %s2453_s29 = smov 64   ;;  %s2454_s23 = smov 4   ;;  %v1577_v49 = vld [vmem:[#allocation4] sm:$0xff] }
 0x750   : > { %2052 = dma.vmem_to_hbm [thread:$0]  (%p3014_p9), %s2884_s8, 256, %s2882_s27, %s1600_s19, %s2453_s29, %s2453_s29, %s2454_s23  }
 0x751   : > { %s3015_s9 = sld [smem:[#allocation26_spill]]  ;;  %s1883_s30 = sshll.u32 %s3012_s20, 7 }
 0x752   : > { %s524_s28 = scalar_lea.vmem [#allocation14], %s1851_s16  ;;  %s3016_s8 = sld [smem:[#allocation27_spill]] }
 0x753   : > { %s1613_s26 = sshll.u32 %s524_s28, 4  ;;  %s1595_s19 = scalar_lea.sflag [#allocation7], %s2749_s1  ;;  %s2922_s26 = int_to_ptr.vmem [resolvable:$true] %s1613_s26 }
 0x754   : > { %s2340_s29 = scalar_lea.vmem %s2922_s26, 128  ;;  %s2455_s16 = smov [#allocation14]  }
 0x755   : > { %p2341_p0 = scmp.ne.s32.totalorder %s2922_s26, %s2340_s29  ;;  %s2344_s20 = sshll.u32 %s2455_s16, 4  ;;  %s2345_s20 = int_to_ptr.vmem [resolvable:$false] %s2344_s20 }
 0x756   : > { %s2346_s23 = scalar_lea.vmem %s2345_s20, 256  ;;  %p2347_p8 = scmp.lt.s32.totalorder %s2922_s26, %s2345_s20 }
 0x757   : > { %v1880_v53 = vld [vmem:[%s3015_s9] ss:$0 sm:$0xff]  ;;  %p2342_p7 = pnand %p2341_p0, %p3014_p9  ;;  %p2348_p3 = scmp.lt.s32.totalorder %s2346_s23, %s2340_s29 }
 0x758   : > { %s2920_s27 = scalar_lea.hbm %s3016_s8, %s1883_s30 }
 0x759   : > { %p2343_p5 = pneg %p2342_p7  ;;  %p2349_p11 = por %p2348_p3, %p2347_p8 }
 0x75b   : > { %p2350_p6 = pnand %p2349_p11, %p2343_p5 }
 0x815   : > { %v1572_v50 = vpop.f32.mrb[8].mxu0 }
 0x816   : > { %v1578_v51 = vadd.f32 %v1577_v49, %v1572_v50  ;;  %v2008_v52 = vpop.f32.mrb[9].mxu0 }
 0x818   : > { %1579 = vst.msk [vmem:[#allocation4] sm:$0xff] %vm558_vm0, %v1578_v51 }
 0x81f   : > { %v1583_v54 = vld [vmem:[#allocation4] sm:$0xff] }
 0x820   : > { %v1591_v55 = vadd.f32 %v1880_v53, %v1583_v54 }
 0x822   : > { %1593 = vst.msk [vmem:[%s524_s28] sm:$0xff] %vm558_vm0, %v1591_v55 }
 0x823   : > { %2353 = shalt.err (!%p2350_p6)
}
 0x824   : > { %s2354_s0 = scalar_lea.hbm %s2920_s27, 128  ;;  %s2358_s21 = scalar_lea.hbm %s3016_s8, 256 }
 0x825   : > { %p2355_p13 = scmp.ne.s32.totalorder %s2920_s27, %s2354_s0  ;;  %p2359_p2 = scmp.lt.u32.totalorder %s2920_s27, %s3016_s8 }
 0x826   : > { %p2360_p10 = scmp.lt.u32.totalorder %s2358_s21, %s2354_s0  ;;  %p2362_p0 = scmp.lt.u32.totalorder %s2354_s0, %s2920_s27 }
 0x827   : > { %p2356_p12 = pnand %p2355_p13, %p3014_p9 }
 0x828   : > { %p2361_p1 = por %p2360_p10, %p2359_p2 }
 0x829   : > { %p2357_p4 = pneg %p2356_p12 }
 0x82a   : > { %p2363_p7 = por %p2362_p0, %p2361_p1 }
 0x82c   : > { %p2364_p5 = pnand %p2363_p7, %p2357_p4 }
 0x82e   : > { %2367 = shalt.err (!%p2364_p5)
}
 0x82f   : > { %2051 = dma.vmem_to_hbm [thread:$0]  (%p3014_p9), %s2922_s26, 128, %s2920_s27, %s1595_s19  }
 0x830 PF: > { %s1644_s30 = sand.u32 1, %s2414_s13   ;;  %p3017_p8 = scmp.ne.s32.totalorder %s3006_s25, 0 }
 0x831   : > { %p3018_p3 = scmp.ge.s32.totalorder %s2434_s18, 2  ;;  %s1645_s28 = scalar_lea.sflag [#allocation7], %s1644_s30 }
 0x833   : > { %p2073_p11 = pnand %p3018_p3, %p3017_p8 }
 0x835   : > { %2405 = dma.done.wait (!%p2073_p11), %s1645_s28, 128  }
 0x836   : > { %2407 = vsyncadd (!%p2073_p11), %s1645_s28, 4294967168  ;;  %s1654_s29 = scalar_lea.sflag [#allocation16], %s1644_s30 }
 0x837   : > { %2409 = dma.done.wait (!%p2073_p11), %s1654_s29, 256  }
 0x838   : > { %2411 = vsyncadd (!%p2073_p11), %s1654_s29, 4294967040  ;;  %s32_s18 = sadd.s32 1, %s2434_s18   ;;  %s3019_s13 = smov %s2418_s14 }
 0x839   : > { %p29_p6 = scmp.ge.s32.totalorder %s32_s18, 4   ;;  %s3020_s14 = smov %s2422_s15 }
 0x83a   : > { %s3021_s15 = smov %s2699_s22  ;;  %s3022_s16 = smov %s2430_s17 }
 0x83b   : > { %s3023_s17 = smov %s3025_s24  ;;  %31 = sbr.rel (!%p29_p6) target bundleno = 17 (0x11), region = 165 }
 0x842   :  { %1659 = vsyncpa [#allocation6], 1 }
 0x843   :  { %1661 = vsyncpa [#allocation6 + $0x1], 1 }
 0x844   :  { %1662 = vsyncpa [#allocation9], 1 }
 0x845   :  { %1663 = vsyncpa [#allocation12], 1 }
 0x846   :  { %1664 = vsyncpa [#allocation7], 1 }
 0x847   :  { %1666 = vsyncpa [#allocation7 + $0x1], 1 }
 0x848   :  { %1667 = vsyncpa [#allocation16], 1 }
 0x849   :  { %1669 = vsyncpa [#allocation16 + $0x1], 1 }

</bundles_post_ra>
